<compile_context>
chip_gen: v7x
topology: tpu7x:2x2x1
jax: 0.10.0
libtpu: 0.0.40
codegen_flags: <defaults>
</compile_context>

<pallas_src>
import functools

import jax
import jax.numpy as jnp
from jax.experimental import pallas as pl
from jax.experimental.pallas import tpu as pltpu

# ---- model hyper-parameters (small, consistent with the module's __init__) ----
B = 2            # batch
SEQ_LEN = 8      # input_len
PRED_LEN = 8     # output_len
IN_DIM = 4       # input_dim
OUT_DIM = 4      # out_dim
LATENT = 32      # latent_dim == inner_t
CAT = IN_DIM + LATENT          # CriticFunc cat dim
CAT4 = CAT // 4                # CriticFunc hidden dim

# paired-rows layout constants
PAIR = SEQ_LEN // IN_DIM       # flat samples packed per kernel row (== 2 here)
NROWS = (B * SEQ_LEN) // PAIR  # kernel rows (== 8)
NFLAT = B * SEQ_LEN            # flat samples (== 16)
HALF = SEQ_LEN // PAIR         # paired rows per batch (== 4)

assert PAIR == 2 and PAIR * IN_DIM == SEQ_LEN and SEQ_LEN % PAIR == 0
# TODO(synk): the paired layout / even-odd w_p1 split assumes SEQ_LEN == 2*IN_DIM;
#             other configs need a PAIR-generic packing.

# ---- packed weight-slab layout (SLAB_ROWS x XW_COLS, float32) ----
XW_COLS = 2 * PAIR * LATENT + PAIR * CAT4      # 128 + 18 = 146
ZW_COLS = PAIR * IN_DIM + PAIR * CAT4          # 8 + 18 = 26
ROW_WX = 0      # 8 rows : [bd(w_loc) | bd(w_var) | bd(w_c1_x)]            (8, 146)
ROW_BX = 8      # 1 row  : [b_loc b_loc | b_var b_var | b_c1 b_c1]         (1, 146)
ROW_BZ = 9      # 1 row  : [b_rec b_rec | zeros]                           (1, 26)
ROW_C2 = 10     # 1 row  : [w_c2^T w_c2^T | b_c2]                          (1, 19)
ROW_BP2 = 11    # 1 row  : [b_p2]                                          (1, 4)
ROW_WZ = 16     # 64 rows: [bd(w_rec) | bd(w_c1_z)]                        (64, 26)
ROW_WP1 = 80    # 16 rows: [bd_B(w_p1_even) | bd_B(w_p1_odd) | b_p1 stack] (16, 17)
ROW_WP2 = 96    # 32 rows: w_p2                                            (32, 4)
SLAB_ROWS = ROW_WP2 + LATENT   # 128


def _vmem():
    return pl.BlockSpec(memory_space=pltpu.MemorySpace.VMEM)


def _smem():
    return pl.BlockSpec(memory_space=pltpu.MemorySpace.SMEM)


def _softplus(x):
    # torch.nn.Softplus(beta=1, threshold=20)
    return jnp.where(x > 20.0, x, jnp.log1p(jnp.exp(jnp.minimum(x, 20.0))))


def _sigmoid(x):
    # exact (no approx reciprocal) for numerical parity with the torch reference
    return 1.0 / (1.0 + jnp.exp(-x))


# --------------------------------------------------------------------------------
# Single fused kernel: VarUnit + RecUnit + ELBO (CORT - KL - rec_err) + MLBO
# (critic, forward-simplified) + prediction head.  3 inputs, 2 outputs, 5 matmuls.
# --------------------------------------------------------------------------------
def _fused_lastblock_kernel(x_ref, eps_ref, w_ref, pred_ref, scal_ref,
                            *, mean_inference: bool):
    f32 = jnp.float32
    zw = PAIR * LATENT

    x_p = x_ref[...]                      # (NROWS, PAIR*IN_DIM) == reshape(-1, seq_len)
    eps_p = eps_ref[...]                  # (NROWS, PAIR*LATENT)

    # ---- static views into the packed weight slab (static slices are free) ----
    W_x = w_ref[ROW_WX:ROW_WX + NROWS, :]                                   # (8, 146)
    b_x = w_ref[ROW_BX:ROW_BX + 1, :]                                       # (1, 146)
    W_z = w_ref[ROW_WZ:ROW_WZ + PAIR * LATENT, 0:ZW_COLS]                   # (64, 26)
    b_z = w_ref[ROW_BZ:ROW_BZ + 1, 0:ZW_COLS]                               # (1, 26)
    w_c2 = w_ref[ROW_C2:ROW_C2 + 1, 0:PAIR * CAT4]                          # (1, 18)
    b_c2 = w_ref[ROW_C2:ROW_C2 + 1, PAIR * CAT4:PAIR * CAT4 + 1]            # (1, 1)
    wp1 = w_ref[ROW_WP1:ROW_WP1 + B * PRED_LEN, 0:2 * NROWS + 1]            # (16, 17)
    w_p2 = w_ref[ROW_WP2:ROW_WP2 + LATENT, 0:OUT_DIM]                       # (32, 4)
    b_p2 = w_ref[ROW_BP2:ROW_BP2 + 1, 0:OUT_DIM]                            # (1, 4)

    # ---- VarUnit loc+var nets and critic x-path: ONE fused MXU pass over x_p ----
    fx = jnp.dot(x_p, W_x, preferred_element_type=f32) + b_x                # (8, 146)
    mean_p = fx[:, :zw]                                                     # (8, 64)
    var_p = _softplus(fx[:, zw:2 * zw])                                     # (8, 64) scale
    hx_b = fx[:, 2 * zw:]                                                   # (8, 18), b_c1 folded in

    qz_p = mean_p + var_p * eps_p         # rsample: mean + scale * eps

    # ---- RecUnit and critic z-path: ONE fused MXU pass over qz_p ----
    rz = jnp.dot(qz_p, W_z, preferred_element_type=f32) + b_z               # (8, 26)
    xrec_p = rz[:, :PAIR * IN_DIM]                                          # (8, 8)
    hz = rz[:, PAIR * IN_DIM:]                                              # (8, 18)

    # ---- block-level rec_err = ((xt_rec - x_his)**2).mean() ----
    d = xrec_p - x_p
    rec_err = jnp.mean(d * d)

    # ---- trend_sim (CORT) on the reshape(-1, seq_len) rows (exact div + eps guard) ----
    xr_d = xrec_p[:, 1:] - xrec_p[:, :-1]
    xh_d = x_p[:, 1:] - x_p[:, :-1]
    num = jnp.sum(xr_d * xh_d, axis=1, keepdims=True)
    den = jnp.sqrt(jnp.sum(xr_d * xr_d, axis=1, keepdims=True) *
                   jnp.sum(xh_d * xh_d, axis=1, keepdims=True))
    cort = jnp.mean(num / (den + 1e-12))

    # ---- KL(q||p) = mean(log_q - log_p); (z - mean)/scale == eps exactly ----
    kl = jnp.mean(0.5 * qz_p * qz_p - 0.5 * eps_p * eps_p - jnp.log(var_p))

    elbo = cort - kl - rec_err            # elbo_t (= cort - kl) minus rec_err

    # ---- MLBO ('our'): CriticFunc(Linear->ReLU->Linear->Sigmoid), positive pairing.
    # The batch-shuffled negative term mean(point * exp(sigmoid(.))) with detached
    # point == 1/mean(exp(.)) is identically 1 in the forward, so mlbo = mean(f_pos) - 1.
    h_pos = jnp.maximum(hx_b + hz, 0.0)                                     # (8, 18)
    t = h_pos * w_c2
    lg_e = jnp.sum(t[:, :CAT4], axis=1, keepdims=True) + b_c2               # flat rows 2r
    lg_o = jnp.sum(t[:, CAT4:], axis=1, keepdims=True) + b_c2               # flat rows 2r+1
    f_pos_sum = jnp.sum(_sigmoid(lg_e)) + jnp.sum(_sigmoid(lg_o))
    mlbo = f_pos_sum / float(NFLAT) - 1.0

    # ---- prediction head, sublane-stacked over batch: one dense (16, 4) store ----
    #   u_b = w_p1 @ z_b + b_p1 ; o_b = u_b @ w_p2 + b_p2   (stacked: rows k*PRED_LEN..)
    z_p = mean_p if mean_inference else qz_p
    z_even = z_p[:, :LATENT]              # (8, 32) even time steps (both batches stacked)
    z_odd = z_p[:, LATENT:]               # (8, 32) odd time steps
    W_pe = wp1[:, 0:NROWS]                # (16, 8) block-diag-over-B even weights
    W_po = wp1[:, NROWS:2 * NROWS]        # (16, 8) block-diag-over-B odd weights
    b_p1 = wp1[:, 2 * NROWS:2 * NROWS + 1]  # (16, 1)
    u = (jnp.dot(W_pe, z_even, preferred_element_type=f32) +
         jnp.dot(W_po, z_odd, preferred_element_type=f32) + b_p1)           # (16, 32)
    pred_ref[...] = jnp.dot(u, w_p2, preferred_element_type=f32) + b_p2     # (16, 4)

    # ---- scalar outputs packed into one SMEM vector ----
    scal_ref[0] = elbo
    scal_ref[1] = mlbo


# --------------------------------------------------------------------------------
# Parameter init (deterministic, nn.Linear-style uniform bounds) -- unchanged.
# --------------------------------------------------------------------------------
def init_params(key):
    ks = jax.random.split(key, 14)

    def lin(kw, kb, fan_in, w_shape, b_shape):
        bound = float(fan_in) ** -0.5
        w = jax.random.uniform(kw, w_shape, jnp.float32, -bound, bound)
        b = jax.random.uniform(kb, b_shape, jnp.float32, -bound, bound)
        return w, b

    w_loc, b_loc = lin(ks[0], ks[1], IN_DIM, (IN_DIM, LATENT), (1, LATENT))
    w_var, b_var = lin(ks[2], ks[3], IN_DIM, (IN_DIM, LATENT), (1, LATENT))
    w_rec, b_rec = lin(ks[4], ks[5], LATENT, (LATENT, IN_DIM), (1, IN_DIM))
    w_c1, b_c1 = lin(ks[6], ks[7], CAT, (CAT, CAT4), (1, CAT4))
    w_c2, b_c2 = lin(ks[8], ks[9], CAT4, (CAT4, 1), (1, 1))
    w_p1, b_p1 = lin(ks[10], ks[11], SEQ_LEN, (PRED_LEN, SEQ_LEN), (PRED_LEN, 1))
    w_p2, b_p2 = lin(ks[12], ks[13], LATENT, (LATENT, OUT_DIM), (1, OUT_DIM))
    return dict(w_loc=w_loc, b_loc=b_loc, w_var=w_var, b_var=b_var,
                w_rec=w_rec, b_rec=b_rec, w_c1=w_c1, b_c1=b_c1,
                w_c2=w_c2, b_c2=b_c2, w_p1=w_p1, b_p1=b_p1,
                w_p2=w_p2, b_p2=b_p2)


# --------------------------------------------------------------------------------
# One-time weight packing (hoisted out of the forward): block-diagonalise, fuse
# columns for the two wide matmuls, and lay everything into ONE f32 slab.
# --------------------------------------------------------------------------------
def _block_diag(w, n):
    """Block-diagonal of n copies of w: (m, k) -> (n*m, n*k)."""
    m, k = w.shape
    out = jnp.zeros((n * m, n * k), w.dtype)
    for i in range(n):
        out = out.at[i * m:(i + 1) * m, i * k:(i + 1) * k].set(w)
    return out


def _tile_cols(b, n):
    return jnp.concatenate([b] * n, axis=1)


def prepare_params(params):
    w_c1x = params["w_c1"][:IN_DIM]                                         # (4, 9)
    w_c1z = params["w_c1"][IN_DIM:]                                         # (32, 9)

    W_x = jnp.concatenate([_block_diag(params["w_loc"], PAIR),
                           _block_diag(params["w_var"], PAIR),
                           _block_diag(w_c1x, PAIR)], axis=1)               # (8, 146)
    b_x = jnp.concatenate([_tile_cols(params["b_loc"], PAIR),
                           _tile_cols(params["b_var"], PAIR),
                           _tile_cols(params["b_c1"], PAIR)], axis=1)       # (1, 146)
    W_z = jnp.concatenate([_block_diag(params["w_rec"], PAIR),
                           _block_diag(w_c1z, PAIR)], axis=1)               # (64, 26)
    b_z = jnp.concatenate([_tile_cols(params["b_rec"], PAIR),
                           jnp.zeros((1, PAIR * CAT4), jnp.float32)], axis=1)   # (1, 26)
    c2_row = jnp.concatenate([_tile_cols(params["w_c2"].T, PAIR),
                              params["b_c2"]], axis=1)                      # (1, 19)
    wp1 = jnp.concatenate([_block_diag(params["w_p1"][:, 0::2], B),
                           _block_diag(params["w_p1"][:, 1::2], B),
                           jnp.concatenate([params["b_p1"]] * B, axis=0)],
                          axis=1)                                           # (16, 17)

    slab = jnp.zeros((SLAB_ROWS, XW_COLS), jnp.float32)
    slab = slab.at[ROW_WX:ROW_WX + NROWS, :].set(W_x)
    slab = slab.at[ROW_BX, :].set(b_x[0])
    slab = slab.at[ROW_BZ, :ZW_COLS].set(b_z[0])
    slab = slab.at[ROW_C2, :PAIR * CAT4 + 1].set(c2_row[0])
    slab = slab.at[ROW_BP2, :OUT_DIM].set(params["b_p2"][0])
    slab = slab.at[ROW_WZ:ROW_WZ + PAIR * LATENT, :ZW_COLS].set(W_z)
    slab = slab.at[ROW_WP1:ROW_WP1 + B * PRED_LEN, :2 * NROWS + 1].set(wp1)
    slab = slab.at[ROW_WP2:ROW_WP2 + LATENT, :OUT_DIM].set(params["w_p2"])
    return slab


# --------------------------------------------------------------------------------
# Hot-path forward: RNG + one fused pallas_call + free reshapes.
# Returns the LaSTBlock tuple (None, x_t, elbo, mlbo, None).
# --------------------------------------------------------------------------------
def lastblock_forward(x, slab, key, mean_inference=False):
    assert x.shape == (B, SEQ_LEN, IN_DIM), x.shape
    # torch: qz = Normal(mean, scale).rsample()
    # TODO(synk): could be generated in-kernel (pltpu.prng_seed + stateful_normal) to
    #             drop this XLA launch, at the cost of changing the random stream.
    eps_p = jax.random.normal(key, (NROWS, PAIR * LATENT), dtype=jnp.float32)
    x_p = x.reshape(NROWS, PAIR * IN_DIM)      # free row-major reshape to paired layout

    kernel = functools.partial(_fused_lastblock_kernel, mean_inference=mean_inference)
    pred_flat, scal = pl.pallas_call(
        kernel,
        out_shape=(
            jax.ShapeDtypeStruct((B * PRED_LEN, OUT_DIM), jnp.float32),
            jax.ShapeDtypeStruct((2,), jnp.float32),
        ),
        in_specs=[_vmem(), _vmem(), _vmem()],
        out_specs=(_vmem(), _smem()),
    )(x_p, eps_p, slab)

    x_pred = pred_flat.reshape(B, PRED_LEN, OUT_DIM)
    # LaSTBlock.forward: (None, x_t, elbo, mlbo, None)
    return None, x_pred, scal[0], scal[1], None


if __name__ == "__main__":
    key = jax.random.PRNGKey(0)
    k_x, k_p, k_noise = jax.random.split(key, 3)
    x = jax.random.normal(k_x, (B, SEQ_LEN, IN_DIM), dtype=jnp.float32)
    params = init_params(k_p)
    slab = prepare_params(params)          # one-time weight packing, outside the hot path
    jax.block_until_ready(slab)

    fwd = jax.jit(lastblock_forward, static_argnames=("mean_inference",))
    _, x_pred, elbo, mlbo, _ = fwd(x, slab, k_noise, mean_inference=False)
    jax.block_until_ready((x_pred, elbo, mlbo))

    assert x_pred.shape == (B, PRED_LEN, OUT_DIM), x_pred.shape
    assert bool(jnp.all(jnp.isfinite(x_pred)))
    assert bool(jnp.isfinite(elbo)) and bool(jnp.isfinite(mlbo))
    print("KERNEL_OK")
</pallas_src>

<mosaic_0001>
module attributes {stable_mosaic.version = 11 : i64} {
  func.func @_fused_lastblock_kernel(%arg0: memref<8x8xf32, #tpu.memory_space<vmem>>, %arg1: memref<8x64xf32, #tpu.memory_space<vmem>>, %arg2: memref<128x146xf32, #tpu.memory_space<vmem>>, %arg3: memref<16x4xf32, #tpu.memory_space<vmem>>, %arg4: memref<2xf32, #tpu.memory_space<smem>>) attributes {dimension_semantics = [], scalar_prefetch = 0 : i64, scratch_operands = 0 : i64, tpu.core_type = #tpu.core_type<tc>} {
    %c0 = arith.constant 0 : index
    %c0_0 = arith.constant 0 : index
    %0 = vector.load %arg0[%c0, %c0_0] : memref<8x8xf32, #tpu.memory_space<vmem>>, vector<8x8xf32>
    %c0_1 = arith.constant 0 : index
    %c0_2 = arith.constant 0 : index
    %1 = vector.load %arg1[%c0_1, %c0_2] : memref<8x64xf32, #tpu.memory_space<vmem>>, vector<8x64xf32>
    %c0_3 = arith.constant 0 : index
    %c0_4 = arith.constant 0 : index
    %2 = vector.load %arg2[%c0_3, %c0_4] : memref<128x146xf32, #tpu.memory_space<vmem>>, vector<8x146xf32>
    %c8 = arith.constant 8 : index
    %c0_5 = arith.constant 0 : index
    %3 = vector.load %arg2[%c8, %c0_5] : memref<128x146xf32, #tpu.memory_space<vmem>>, vector<1x146xf32>
    %c16 = arith.constant 16 : index
    %c0_6 = arith.constant 0 : index
    %4 = vector.load %arg2[%c16, %c0_6] : memref<128x146xf32, #tpu.memory_space<vmem>>, vector<64x26xf32>
    %c9 = arith.constant 9 : index
    %c0_7 = arith.constant 0 : index
    %5 = vector.load %arg2[%c9, %c0_7] : memref<128x146xf32, #tpu.memory_space<vmem>>, vector<1x26xf32>
    %c10 = arith.constant 10 : index
    %c0_8 = arith.constant 0 : index
    %6 = vector.load %arg2[%c10, %c0_8] : memref<128x146xf32, #tpu.memory_space<vmem>>, vector<1x18xf32>
    %c10_9 = arith.constant 10 : index
    %c18 = arith.constant 18 : index
    %7 = vector.load %arg2[%c10_9, %c18] : memref<128x146xf32, #tpu.memory_space<vmem>>, vector<1x1xf32>
    %c80 = arith.constant 80 : index
    %c0_10 = arith.constant 0 : index
    %8 = vector.load %arg2[%c80, %c0_10] : memref<128x146xf32, #tpu.memory_space<vmem>>, vector<16x17xf32>
    %c96 = arith.constant 96 : index
    %c0_11 = arith.constant 0 : index
    %9 = vector.load %arg2[%c96, %c0_11] : memref<128x146xf32, #tpu.memory_space<vmem>>, vector<32x4xf32>
    %c11 = arith.constant 11 : index
    %c0_12 = arith.constant 0 : index
    %10 = vector.load %arg2[%c11, %c0_12] : memref<128x146xf32, #tpu.memory_space<vmem>>, vector<1x4xf32>
    %cst = arith.constant dense<0.000000e+00> : vector<8x146xf32>
    %11 = tpu.matmul %0, %2, %cst {dimension_numbers = #tpu.dot_dimension_numbers<[1], [0], [0], [1], [0, 0, 1, 1], [], []>} : vector<8x8xf32>, vector<8x146xf32>, vector<8x146xf32> -> vector<8x146xf32>
    %12 = vector.broadcast %3 : vector<1x146xf32> to vector<8x146xf32>
    %13 = arith.addf %11, %12 : vector<8x146xf32>
    %14 = vector.extract_strided_slice %13 {offsets = [0, 0], sizes = [8, 64], strides = [1, 1]} : vector<8x146xf32> to vector<8x64xf32>
    %15 = vector.extract_strided_slice %13 {offsets = [0, 64], sizes = [8, 64], strides = [1, 1]} : vector<8x146xf32> to vector<8x64xf32>
    %cst_13 = arith.constant 2.000000e+01 : f32
    %16 = vector.broadcast %cst_13 : f32 to vector<8x64xf32>
    %17 = arith.cmpf ogt, %15, %16 : vector<8x64xf32>
    %cst_14 = arith.constant 2.000000e+01 : f32
    %18 = vector.broadcast %cst_14 : f32 to vector<8x64xf32>
    %19 = arith.minimumf %15, %18 : vector<8x64xf32>
    %20 = math.exp %19 : vector<8x64xf32>
    %21 = math.log1p %20 : vector<8x64xf32>
    %22 = arith.select %17, %15, %21 : vector<8x64xi1>, vector<8x64xf32>
    %23 = vector.extract_strided_slice %13 {offsets = [0, 128], sizes = [8, 18], strides = [1, 1]} : vector<8x146xf32> to vector<8x18xf32>
    %24 = arith.mulf %22, %1 : vector<8x64xf32>
    %25 = arith.addf %14, %24 : vector<8x64xf32>
    %cst_15 = arith.constant dense<0.000000e+00> : vector<8x26xf32>
    %26 = tpu.matmul %25, %4, %cst_15 {dimension_numbers = #tpu.dot_dimension_numbers<[1], [0], [0], [1], [0, 0, 1, 1], [], []>} : vector<8x64xf32>, vector<64x26xf32>, vector<8x26xf32> -> vector<8x26xf32>
    %27 = vector.broadcast %5 : vector<1x26xf32> to vector<8x26xf32>
    %28 = arith.addf %26, %27 : vector<8x26xf32>
    %29 = vector.extract_strided_slice %28 {offsets = [0, 0], sizes = [8, 8], strides = [1, 1]} : vector<8x26xf32> to vector<8x8xf32>
    %30 = vector.extract_strided_slice %28 {offsets = [0, 8], sizes = [8, 18], strides = [1, 1]} : vector<8x26xf32> to vector<8x18xf32>
    %31 = arith.subf %29, %0 : vector<8x8xf32>
    %32 = arith.mulf %31, %31 : vector<8x8xf32>
    %33 = vector.shape_cast %32 : vector<8x8xf32> to vector<1x8x8xf32>
    %cst_16 = arith.constant dense<0.000000e+00> : vector<1xf32>
    %34 = vector.multi_reduction <add>, %33, %cst_16 [1, 2] : vector<1x8x8xf32> to vector<1xf32>
    %35 = vector.shape_cast %34 : vector<1xf32> to vector<1x1x1xf32>
    %36 = vector.extract %35[0, 0, 0] : f32 from vector<1x1x1xf32>
    %cst_17 = arith.constant 6.400000e+01 : f32
    %37 = arith.divf %36, %cst_17 : f32
    %38 = vector.extract_strided_slice %29 {offsets = [0, 1], sizes = [8, 7], strides = [1, 1]} : vector<8x8xf32> to vector<8x7xf32>
    %39 = vector.extract_strided_slice %29 {offsets = [0, 0], sizes = [8, 7], strides = [1, 1]} : vector<8x8xf32> to vector<8x7xf32>
    %40 = arith.subf %38, %39 : vector<8x7xf32>
    %41 = vector.extract_strided_slice %0 {offsets = [0, 1], sizes = [8, 7], strides = [1, 1]} : vector<8x8xf32> to vector<8x7xf32>
    %42 = vector.extract_strided_slice %0 {offsets = [0, 0], sizes = [8, 7], strides = [1, 1]} : vector<8x8xf32> to vector<8x7xf32>
    %43 = arith.subf %41, %42 : vector<8x7xf32>
    %44 = arith.mulf %40, %43 : vector<8x7xf32>
    %cst_18 = arith.constant dense<0.000000e+00> : vector<8xf32>
    %45 = vector.multi_reduction <add>, %44, %cst_18 [1] : vector<8x7xf32> to vector<8xf32>
    %46 = vector.shape_cast %45 : vector<8xf32> to vector<8x1xf32>
    %47 = arith.mulf %40, %40 : vector<8x7xf32>
    %cst_19 = arith.constant dense<0.000000e+00> : vector<8xf32>
    %48 = vector.multi_reduction <add>, %47, %cst_19 [1] : vector<8x7xf32> to vector<8xf32>
    %49 = vector.shape_cast %48 : vector<8xf32> to vector<8x1xf32>
    %50 = arith.mulf %43, %43 : vector<8x7xf32>
    %cst_20 = arith.constant dense<0.000000e+00> : vector<8xf32>
    %51 = vector.multi_reduction <add>, %50, %cst_20 [1] : vector<8x7xf32> to vector<8xf32>
    %52 = vector.shape_cast %51 : vector<8xf32> to vector<8x1xf32>
    %53 = arith.mulf %49, %52 : vector<8x1xf32>
    %54 = math.sqrt %53 : vector<8x1xf32>
    %cst_21 = arith.constant 9.99999996E-13 : f32
    %55 = vector.broadcast %cst_21 : f32 to vector<8x1xf32>
    %56 = arith.addf %54, %55 : vector<8x1xf32>
    %57 = arith.divf %46, %56 : vector<8x1xf32>
    %58 = vector.shape_cast %57 : vector<8x1xf32> to vector<1x8x1xf32>
    %cst_22 = arith.constant dense<0.000000e+00> : vector<1xf32>
    %59 = vector.multi_reduction <add>, %58, %cst_22 [1, 2] : vector<1x8x1xf32> to vector<1xf32>
    %60 = vector.shape_cast %59 : vector<1xf32> to vector<1x1x1xf32>
    %61 = vector.extract %60[0, 0, 0] : f32 from vector<1x1x1xf32>
    %cst_23 = arith.constant 8.000000e+00 : f32
    %62 = arith.divf %61, %cst_23 : f32
    %cst_24 = arith.constant 5.000000e-01 : f32
    %63 = vector.broadcast %cst_24 : f32 to vector<8x64xf32>
    %64 = arith.mulf %63, %25 : vector<8x64xf32>
    %65 = arith.mulf %64, %25 : vector<8x64xf32>
    %cst_25 = arith.constant 5.000000e-01 : f32
    %66 = vector.broadcast %cst_25 : f32 to vector<8x64xf32>
    %67 = arith.mulf %66, %1 : vector<8x64xf32>
    %68 = arith.mulf %67, %1 : vector<8x64xf32>
    %69 = arith.subf %65, %68 : vector<8x64xf32>
    %70 = math.log %22 : vector<8x64xf32>
    %71 = arith.subf %69, %70 : vector<8x64xf32>
    %72 = vector.shape_cast %71 : vector<8x64xf32> to vector<1x8x64xf32>
    %cst_26 = arith.constant dense<0.000000e+00> : vector<1xf32>
    %73 = vector.multi_reduction <add>, %72, %cst_26 [1, 2] : vector<1x8x64xf32> to vector<1xf32>
    %74 = vector.shape_cast %73 : vector<1xf32> to vector<1x1x1xf32>
    %75 = vector.extract %74[0, 0, 0] : f32 from vector<1x1x1xf32>
    %cst_27 = arith.constant 5.120000e+02 : f32
    %76 = arith.divf %75, %cst_27 : f32
    %77 = arith.subf %62, %76 : f32
    %78 = arith.subf %77, %37 : f32
    %79 = arith.addf %23, %30 : vector<8x18xf32>
    %cst_28 = arith.constant 0.000000e+00 : f32
    %80 = vector.broadcast %cst_28 : f32 to vector<8x18xf32>
    %81 = arith.maximumf %79, %80 : vector<8x18xf32>
    %82 = vector.broadcast %6 : vector<1x18xf32> to vector<8x18xf32>
    %83 = arith.mulf %81, %82 : vector<8x18xf32>
    %84 = vector.extract_strided_slice %83 {offsets = [0, 0], sizes = [8, 9], strides = [1, 1]} : vector<8x18xf32> to vector<8x9xf32>
    %cst_29 = arith.constant dense<0.000000e+00> : vector<8xf32>
    %85 = vector.multi_reduction <add>, %84, %cst_29 [1] : vector<8x9xf32> to vector<8xf32>
    %86 = vector.shape_cast %85 : vector<8xf32> to vector<8x1xf32>
    %87 = vector.broadcast %7 : vector<1x1xf32> to vector<8x1xf32>
    %88 = arith.addf %86, %87 : vector<8x1xf32>
    %89 = vector.extract_strided_slice %83 {offsets = [0, 9], sizes = [8, 9], strides = [1, 1]} : vector<8x18xf32> to vector<8x9xf32>
    %cst_30 = arith.constant dense<0.000000e+00> : vector<8xf32>
    %90 = vector.multi_reduction <add>, %89, %cst_30 [1] : vector<8x9xf32> to vector<8xf32>
    %91 = vector.shape_cast %90 : vector<8xf32> to vector<8x1xf32>
    %92 = vector.broadcast %7 : vector<1x1xf32> to vector<8x1xf32>
    %93 = arith.addf %91, %92 : vector<8x1xf32>
    %cst_31 = arith.constant 0.000000e+00 : f32
    %94 = vector.broadcast %cst_31 : f32 to vector<8x1xf32>
    %95 = arith.subf %94, %88 : vector<8x1xf32>
    %96 = math.exp %95 : vector<8x1xf32>
    %cst_32 = arith.constant 1.000000e+00 : f32
    %97 = vector.broadcast %cst_32 : f32 to vector<8x1xf32>
    %98 = arith.addf %97, %96 : vector<8x1xf32>
    %cst_33 = arith.constant 1.000000e+00 : f32
    %99 = vector.broadcast %cst_33 : f32 to vector<8x1xf32>
    %100 = arith.divf %99, %98 : vector<8x1xf32>
    %101 = vector.shape_cast %100 : vector<8x1xf32> to vector<1x8x1xf32>
    %cst_34 = arith.constant dense<0.000000e+00> : vector<1xf32>
    %102 = vector.multi_reduction <add>, %101, %cst_34 [1, 2] : vector<1x8x1xf32> to vector<1xf32>
    %103 = vector.shape_cast %102 : vector<1xf32> to vector<1x1x1xf32>
    %104 = vector.extract %103[0, 0, 0] : f32 from vector<1x1x1xf32>
    %cst_35 = arith.constant 0.000000e+00 : f32
    %105 = vector.broadcast %cst_35 : f32 to vector<8x1xf32>
    %106 = arith.subf %105, %93 : vector<8x1xf32>
    %107 = math.exp %106 : vector<8x1xf32>
    %cst_36 = arith.constant 1.000000e+00 : f32
    %108 = vector.broadcast %cst_36 : f32 to vector<8x1xf32>
    %109 = arith.addf %108, %107 : vector<8x1xf32>
    %cst_37 = arith.constant 1.000000e+00 : f32
    %110 = vector.broadcast %cst_37 : f32 to vector<8x1xf32>
    %111 = arith.divf %110, %109 : vector<8x1xf32>
    %112 = vector.shape_cast %111 : vector<8x1xf32> to vector<1x8x1xf32>
    %cst_38 = arith.constant dense<0.000000e+00> : vector<1xf32>
    %113 = vector.multi_reduction <add>, %112, %cst_38 [1, 2] : vector<1x8x1xf32> to vector<1xf32>
    %114 = vector.shape_cast %113 : vector<1xf32> to vector<1x1x1xf32>
    %115 = vector.extract %114[0, 0, 0] : f32 from vector<1x1x1xf32>
    %116 = arith.addf %104, %115 : f32
    %cst_39 = arith.constant 1.600000e+01 : f32
    %117 = arith.divf %116, %cst_39 : f32
    %cst_40 = arith.constant 1.000000e+00 : f32
    %118 = arith.subf %117, %cst_40 : f32
    %119 = vector.extract_strided_slice %25 {offsets = [0, 0], sizes = [8, 32], strides = [1, 1]} : vector<8x64xf32> to vector<8x32xf32>
    %120 = vector.extract_strided_slice %25 {offsets = [0, 32], sizes = [8, 32], strides = [1, 1]} : vector<8x64xf32> to vector<8x32xf32>
    %121 = vector.extract_strided_slice %8 {offsets = [0, 0], sizes = [16, 8], strides = [1, 1]} : vector<16x17xf32> to vector<16x8xf32>
    %122 = vector.extract_strided_slice %8 {offsets = [0, 8], sizes = [16, 8], strides = [1, 1]} : vector<16x17xf32> to vector<16x8xf32>
    %123 = vector.extract_strided_slice %8 {offsets = [0, 16], sizes = [16, 1], strides = [1, 1]} : vector<16x17xf32> to vector<16x1xf32>
    %cst_41 = arith.constant dense<0.000000e+00> : vector<16x32xf32>
    %124 = tpu.matmul %121, %119, %cst_41 {dimension_numbers = #tpu.dot_dimension_numbers<[1], [0], [0], [1], [0, 0, 1, 1], [], []>} : vector<16x8xf32>, vector<8x32xf32>, vector<16x32xf32> -> vector<16x32xf32>
    %cst_42 = arith.constant dense<0.000000e+00> : vector<16x32xf32>
    %125 = tpu.matmul %122, %120, %cst_42 {dimension_numbers = #tpu.dot_dimension_numbers<[1], [0], [0], [1], [0, 0, 1, 1], [], []>} : vector<16x8xf32>, vector<8x32xf32>, vector<16x32xf32> -> vector<16x32xf32>
    %126 = arith.addf %124, %125 : vector<16x32xf32>
    %127 = vector.broadcast %123 : vector<16x1xf32> to vector<16x32xf32>
    %128 = arith.addf %126, %127 : vector<16x32xf32>
    %cst_43 = arith.constant dense<0.000000e+00> : vector<16x4xf32>
    %129 = tpu.matmul %128, %9, %cst_43 {dimension_numbers = #tpu.dot_dimension_numbers<[1], [0], [0], [1], [0, 0, 1, 1], [], []>} : vector<16x32xf32>, vector<32x4xf32>, vector<16x4xf32> -> vector<16x4xf32>
    %130 = vector.broadcast %10 : vector<1x4xf32> to vector<16x4xf32>
    %131 = arith.addf %129, %130 : vector<16x4xf32>
    %c0_44 = arith.constant 0 : index
    %c0_45 = arith.constant 0 : index
    %132 = vector.load %arg3[%c0_44, %c0_45] : memref<16x4xf32, #tpu.memory_space<vmem>>, vector<16x4xf32>
    tpu.vector_store %arg3[%c0_44, %c0_45], %131 {strides = array<i32>} : memref<16x4xf32, #tpu.memory_space<vmem>>, vector<16x4xf32>,
    %c0_46 = arith.constant 0 : index
    %133 = memref.load %arg4[%c0_46] : memref<2xf32, #tpu.memory_space<smem>>
    memref.store %78, %arg4[%c0_46] : memref<2xf32, #tpu.memory_space<smem>>
    %c1 = arith.constant 1 : index
    %134 = memref.load %arg4[%c1] : memref<2xf32, #tpu.memory_space<smem>>
    memref.store %118, %arg4[%c1] : memref<2xf32, #tpu.memory_space<smem>>
    return
  }
}

</mosaic_0001>

<bundles_post_ra>
// kernel: lastblock_forward.1
= control target key start
LH: loop header
LB: loop body
LE: loop exit
PB: predicated region body
PF: predicated region fallthrough
CT: control target
= control target key end

     0   :  { %vm51_vm0 = vcmask 64512   ;;  %v823_v3 = vmov 0.0   ;;  %s987_s0 = inlined_call_operand.vmem [shape: f32[8,8], index: 0, kind: input, shape index: {}]   ;;  %s988_s1 = inlined_call_operand.vmem [shape: f32[8,64], index: 1, kind: input, shape index: {}]   ;;  %s989_s2 = inlined_call_operand.vmem [shape: f32[128,146], index: 2, kind: input, shape index: {}]   ;;  %s990_s3 = inlined_call_operand.vmem [shape: f32[16,4], index: 3, kind: output, shape index: {0}]   ;;  %s991_s4 = inlined_call_operand.vmem [shape: f32[2], index: 4, kind: output, shape index: {1}]  }
   0x1   :  { %v20_v0 = vld [vmem:[%s989_s2 + $0x8] sm:$0xff]  ;;  %v19_v1 = vld [vmem:[%s989_s2] sm:$0xff]  ;;  %119 = vmatprep.mubr.f32.mxu0 %v823_v3 }
   0x2   :  { %v869_v2 = vld [vmem:[%s987_s0] sm:$0xff]  ;;  %55 = vmatprep.subr.mxu0 %v20_v0 }
   0x3   :  { %v874_v4 = vld [vmem:[%s988_s1] sm:$0xff] }
   0x4   :  { %10 = vsyncpa [#allocation3], 0  ;;  %56 = vmatpush1.msra.mxu0 %v19_v1  ;;  %s824_s23 = smov 64   ;;  %v23_v5 = vld [vmem:[%s989_s2 + $0x20] sm:$0xff]  ;;  %v24_v6 = vld [vmem:[%s989_s2 + $0x30] sm:$0xff]  ;;  %v825_v8 = vmov 0.0|0.0   ;;  %v41_v18 = vlaneseq }
   0x5   :  { %141 = vrot.lane.b32.xlu0 %v874_v4, %s824_s23  ;;  %675 = vmatmul.mubr.msk.f32.vlgmr.msra.gmra.mrb[0].mxu0 %vm51_vm0, %v869_v2  ;;  %v25_v7 = vld [vmem:[%s989_s2 + $0x40] sm:$0xff]  ;;  %v746_v9 = vpack.c.bf16 %v24_v6, %v23_v5  ;;  %v26_v10 = vld [vmem:[%s989_s2 + $0x50] sm:$0xff]  ;;  %vm826_vm1 = vmmov 0   ;;  %s827_s16 = smov 120   ;;  %vm150_vm4 = vcmask 523264   ;;  %s828_s17 = smov 96  }
   0x6   :  { %745 = vmatprep.subr.bf16.mxu1 %v825_v8  ;;  %v749_v11 = vpack.c.bf16 %v26_v10, %v25_v7  ;;  %v27_v12 = vld [vmem:[%s989_s2 + $0x60] sm:$0xff]  ;;  %v28_v13 = vld [vmem:[%s989_s2 + $0x70] sm:$0xff]  ;;  %v904_v19 = vshrl.u32 %v41_v18, 7  ;;  %721 = vmatprep.mubr.msk.f32.mxu1 %vm826_vm1, %v823_v3  ;;  %s829_s22 = smov 1   ;;  %v830_v51 = vmov 16   ;;  %s831_s25 = smov 127  }
   0x7   :  { %747 = vmatpush3.bf16.msra.mxu1 %v746_v9  ;;  %v752_v14 = vpack.c.bf16 %v28_v13, %v27_v12  ;;  %v29_v15 = vld [vmem:[%s989_s2 + $0x80] sm:$0xff]  ;;  %v30_v16 = vld [vmem:[%s989_s2 + $0x90] sm:$0xff]  ;;  %790 = vset.pattern.permute.xlu1 %v830_v51  ;;  %s832_s26 = smov 119   ;;  %vm331_vm5 = vcmask 72704   ;;  %vm253_vm6 = vcmask 56320   ;;  %s833_s8 = smov 110  }
   0x8   :  { %748 = vmatprep.subr.bf16.mxu1 %v825_v8  ;;  %v755_v17 = vpack.c.bf16 %v30_v16, %v29_v15  ;;  %v43_v20 = vsub.s32 0, %v904_v19  ;;  %v674_v21 = vld [vmem:[%s989_s2 + $0x10] ss:$8 sm:$0x3]  ;;  %v925_v43 = vld [vmem:[%s989_s2 + $0xa0] sm:$0xff]  ;;  %789 = vset.pattern.permute.xlu0 %v830_v51  ;;  %v47_v52 = vsub.s32 1, %v904_v19 }
   0x9   :  { %v34_v40 = vld [vmem:[%s989_s2 + $0xb0] sm:$0xff]  ;;  %vm566_vm7 = vcmask 261120   ;;  %vm284_vm10 = vcmask 7168   ;;  %vm648_vm11 = vcmask 31744  }
   0xa   :  { %v44_v22 = vrot.slane %v674_v21, %v43_v20  ;;  %v31_v47 = vld [vmem:[%s989_s2 + $0x11] ss:$0 sm:$0xff]  ;;  %v48_v53 = vrot.slane %v674_v21, %v47_v52  ;;  %v32_v59 = vld [vmem:[%s989_s2 + $0x12] ss:$0 sm:$0xff] }
   0xb   :  { %750 = vmatpush3.bf16.msra.mxu1 %v749_v11  ;;  %v35_v11 = vld [vmem:[%s989_s2 + $0xc0] sm:$0xff]  ;;  %v36_v12 = vld [vmem:[%s989_s2 + $0xd0] sm:$0xff] }
   0xc   :  { %751 = vmatprep.subr.bf16.mxu1 %v825_v8  ;;  %v757_v13 = vpack.c.bf16 %v36_v12, %v35_v11  ;;  %v38_v15 = vld [vmem:[%s989_s2 + $0xf0] sm:$0xff] }
   0xf   :  { %753 = vmatpush3.bf16.msra.mxu1 %v752_v14  ;;  %v37_v14 = vld [vmem:[%s989_s2 + $0xe0] sm:$0xff] }
  0x10   :  { %754 = vmatprep.subr.bf16.mxu1 %v825_v8 }
  0x13   :  { %756 = vmatpush3.bf16.msra.mxu1 %v755_v17  ;;  %v761_v17 = vpack.c.bf16 %v38_v15, %v37_v14  ;;  %v39_v15 = vld [vmem:[%s989_s2 + $0x13] ss:$0 sm:$0xff] }
  0x77   :  { %v142_v36 = vpop.permute.xlu0 %141 }
  0xd8   :  { %v121_v23 = vpop.f32.mrb[0].mxu0 }
  0xd9   :  { %v122_v24 = vadd.f32 %v121_v23, %v44_v22  ;;  %v123_v25 = vpop.f32.mrb[1].mxu0 }
  0xda   :  { %v124_v54 = vadd.f32 %v123_v25, %v48_v53 }
  0xdb   :  { %v127_v26 = vmin.f32 %v122_v24, 20.0  ;;  %vm126_vm3 = vcmp.gt.f32.partialorder %v122_v24, 20.0 }
  0xdd   :  { %v128_v27 = vmul.f32 1.442695, %v127_v26 }
  0xdf   :  { %791 = vpow2.f32 %v128_v27 }
  0xe9   :  { %v792_v28 = vpop.eup %791 }
  0xea   :  { %v130_v29 = vadd.f32 1.0, %v792_v28  ;;  %v133_v30 = vmul.f32 -0.5, %v792_v28  ;;  %v136_v32 = vand.u32 2147483647, %v792_v28 }
  0xec   :  { %793 = vlog2.f32 %v130_v29  ;;  %v134_v31 = vadd.f32 1.0, %v133_v30  ;;  %vm137_vm2 = vcmp.lt.f32.partialorder %v136_v32, 0.0004427343 }
  0xee   :  { %v135_v35 = vmul.f32 %v792_v28, %v134_v31 }
  0xf6   :  { %v794_v33 = vpop.eup %793 }
  0xf7   :  { %v132_v34 = vmul.f32 0.6931472, %v794_v33 }
  0xf9   :  { %v138_v37 = vsel %vm137_vm2, %v135_v35, %v132_v34 }
  0xfa   :  { %v910_v38 = vsel %vm126_vm3, %v122_v24, %v138_v37 }
  0xfb   :  { %v144_v39 = vmul.f32 %v142_v36, %v910_v38 }
  0xfd   :  { %146 = vrot.lane.b32.xlu0 %v144_v39, %s824_s23 }
 0x101   :  { %393 = vrot.lane.b32.xlu0 %v34_v40, %s827_s16 }
 0x16f   :  { %v147_v41 = vpop.permute.xlu0 %146 }
 0x170   :  { %v917_v42 = vadd.f32 %v147_v41, %v122_v24 }
 0x172   :  { %395 = vrot.lane.b32.xlu1 %v917_v42, %s828_s17  ;;  %722 = vmatmul.mubr.msk.f32.vlgmr.msra.gmra.mrb[0].mxu1 %vm150_vm4, %v917_v42 }
 0x173   :  { %v394_v45 = vpop.permute.xlu0 %393 }
 0x176   :  { %391 = vrot.lane.b32.xlu1 %v925_v43, %s827_s16 }
 0x1e4   :  { %v396_v44 = vpop.permute.xlu1 %395 }
 0x1e5   :  { %724 = vmatprep.subr.mxu0 %v396_v44 }
 0x1e6   :  { %725 = vmatpush3.msra.mxu0 %v396_v44 }
 0x1e7   :  { %729 = vmatprep.subr.mxu0 %v917_v42 }
 0x1e8   :  { %v392_v46 = vpop.permute.xlu1 %391 }
 0x1e9   :  { %726 = vmatprep.mubr.msk.f32.mxu0 %vm51_vm0, %v392_v46 }
 0x1ea   :  { %727 = vmatmul.mubr.msk.f32.vlgmr.msra.gmra.mrb[2].mxu0 %vm51_vm0, %v394_v45 }
 0x1eb   :  { %730 = vmatpush3.msra.mxu0 %v917_v42  ;;  %731 = vmatprep.mubr.msk.f32.mxu0 %vm51_vm0, %v925_v43 }
 0x1ec   :  { %758 = vmatprep.subr.bf16.mxu0 %v757_v13 }
 0x1f2   :  { %732 = vmatmul.mubr.msk.f32.vlgmr.msra.gmra.mrb[2].mxu0 %vm51_vm0, %v34_v40 }
 0x1f3   :  { %760 = vmatpush3.bf16.msra.mxu0 %v757_v13 }
 0x1f4   :  { %762 = vmatprep.subr.bf16.mxu0 %v761_v17 }
 0x1f7   :  { %764 = vmatpush3.bf16.msra.mxu0 %v761_v17 }
 0x245   :  { %v220_v48 = vpop.f32.mrb[0].mxu1 }
 0x246   :  { %v938_v49 = vadd.f32 %v220_v48, %v31_v47  ;;  %v723_v50 = vpop.f32.mrb[1].mxu1  ;;  %v300_v48 = vmul.f32 0.5, %v874_v4 }
 0x247   :  { %v298_v50 = vmul.f32 0.5, %v917_v42 }
 0x248   :  { %240 = vrot.lane.b32.xlu0 %v938_v49, %s829_s22  ;;  %325 = vrot.lane.b32.xlu1 %v938_v49, %s827_s16  ;;  %v224_v46 = vsub.f32 %v938_v49, %v869_v2 }
 0x24a   :  { %v225_v47 = vmul.f32 %v224_v46, %v224_v46 }
 0x24c   :  { %244 = vrot.lane.b32.xlu1 %v869_v2, %s829_s22  ;;  %v226_v52 = vsel %vm51_vm0, %v225_v47, 0.0 }
 0x2ba   :  { %v326_v55 = vpop.permute.xlu1 %325  ;;  %v241_v56 = vpop.permute.xlu0 %240 }
 0x2bb   :  { %v328_v57 = vadd.f32 %v326_v55, %v124_v54  ;;  %v243_v58 = vsub.f32 %v938_v49, %v241_v56  ;;  %v301_v54 = vmul.f32 %v300_v48, %v874_v4  ;;  %v299_v56 = vmul.f32 %v298_v50, %v917_v42 }
 0x2bd   :  { %v329_v60 = vmax.f32 %v328_v57, 0.0  ;;  %v257_v61 = vmul.f32 %v243_v58, %v243_v58 }
 0x2be   :  { %v245_v62 = vpop.permute.xlu1 %244 }
 0x2bf   :  { %v330_v63 = vmul.f32 %v329_v60, %v32_v59  ;;  %v247_v0 = vsub.f32 %v869_v2, %v245_v62  ;;  %259 = vrot.lane.b32.xlu1 %v257_v61, %s831_s25 }
 0x2c1   :  { %v265_v1 = vmul.f32 %v247_v0, %v247_v0  ;;  %337 = vrot.lane.b32.xlu0 %v330_v63, %s832_s26  ;;  %v332_v3 = vsel %vm331_vm5, %v330_v63, 0.0  ;;  %v248_v5 = vmul.f32 %v247_v0, %v243_v58 }
 0x2c5   :  { %267 = vrot.lane.b32.xlu0 %v265_v1, %s831_s25  ;;  %v733_v6 = vpop.f32.mrb[2].mxu0 }
 0x2c6   :  { %v547_v16 = vpop.f32.mrb[3].mxu0 }
 0x2e3   :  { %333 = vadd.xlane.f32.xlu1 %v332_v3 }
 0x2f4   :  { %561 = vperm.xlu1 %790, %v34_v40  }
 0x2f8   :  { %250 = vrot.lane.b32.xlu1 %v248_v5, %s831_s25  ;;  %s663_s25 = sshll.u32 %s991_s4, 4  ;;  %s664_s25 = int_to_ptr.vmem [resolvable:$true] %s663_s25 }
 0x2f9   :  { %s809_s1 = scalar_lea.vmem %s664_s25, 16  ;;  %p814_p1 = scmp.lt.s32.totalorder %s664_s25, %s664_s25 }
 0x2fa   :  { %p810_p0 = scmp.ne.s32.totalorder %s664_s25, %s809_s1  ;;  %p815_p2 = scmp.lt.s32.totalorder %s809_s1, %s809_s1 }
 0x2fc   :  { %p816_p3 = por %p815_p2, %p814_p1 }
 0x2fe   :  { %p817_p4 = pnand %p816_p3, %p810_p0 }
 0x331   :  { %v260_v7 = vpop.permute.xlu1 %259 }
 0x332   :  { %v262_v8 = vsel %vm253_vm6, %v260_v7, 0.0 }
 0x333   :  { %263 = vadd.xlane.f32.xlu1 %v262_v8  ;;  %v338_v9 = vpop.permute.xlu0 %337 }
 0x334   :  { %v340_v10 = vsel %vm331_vm5, %v338_v9, 0.0 }
 0x335   :  { %341 = vadd.xlane.f32.xlu0 %v340_v10 }
 0x337   :  { %v268_v18 = vpop.permute.xlu0 %267 }
 0x338   :  { %v270_v19 = vsel %vm253_vm6, %v268_v18, 0.0 }
 0x34b   :  { %557 = vperm.xlu0 %789, %v925_v43  }
 0x36a   :  { %271 = vadd.xlane.f32.xlu0 %v270_v19 }
 0x370   :  { %v334_v20 = vpop.xlane.xlu1 %333 }
 0x371   :  { %v335_v21 = vadd.f32 %v334_v20, %v32_v59 }
 0x373   :  { %v344_v22 = vsub.f32 0.0, %v335_v21 }
 0x374   :  { %v562_v23 = vpop.permute.xlu1 %561 }
 0x375   :  { %v345_v24 = vmul.f32 1.442695, %v344_v22  ;;  %v565_v25 = vadd.f32 %v733_v6, %v562_v23 }
 0x377   :  { %795 = vpow2.f32 %v345_v24 }
 0x378   :  { %v251_v26 = vpop.permute.xlu1 %250  ;;  %797 = vlog2.f32 %v910_v38 }
 0x379   :  { %v254_v27 = vsel %vm253_vm6, %v251_v26, 0.0 }
 0x37a   :  { %255 = vadd.xlane.f32.xlu1 %v254_v27 }
 0x381   :  { %v796_v28 = vpop.eup %795 }
 0x382   :  { %v347_v29 = vadd.f32 1.0, %v796_v28  ;;  %v798_v30 = vpop.eup %797 }
 0x383   :  { %v304_v31 = vmul.f32 0.6931472, %v798_v30 }
 0x384   :  { %799 = vrcp.f32 %v347_v29 }
 0x38b   :  { %306 = vrot.lane.b32.xlu1 %v304_v31, %s824_s23 }
 0x38e   :  { %v800_v32 = vpop.eup %799 }
 0x38f   :  { %351 = vrot.lane.b32.xlu0 %v800_v32, %s833_s8 }
 0x3c0   :  { %v264_v43 = vpop.xlane.xlu1 %263 }
 0x3c2   :  { %v342_v33 = vpop.xlane.xlu0 %341 }
 0x3c3   :  { %v343_v34 = vadd.f32 %v342_v33, %v32_v59  ;;  %v302_v59 = vsub.f32 %v299_v56, %v301_v54 }
 0x3c5   :  { %v364_v35 = vsub.f32 0.0, %v343_v34 }
 0x3c7   :  { %v365_v36 = vmul.f32 1.442695, %v364_v35 }
 0x3c9   :  { %801 = vpow2.f32 %v365_v36 }
 0x3ca   :  { %v558_v37 = vpop.permute.xlu0 %557 }
 0x3cb   :  { %v564_v39 = vadd.f32 %v558_v37, %v547_v16 }
 0x3cd   :  { %742 = vmatprep.mubr.msk.f32.mxu0 %vm566_vm7, %v564_v39 }
 0x3ce   :  { %743 = vmatmul.mubr.msk.f32.vlgmr.msra.gmra.mrb[4].mxu0 %vm566_vm7, %v565_v25 }
 0x3d3   :  { %v802_v38 = vpop.eup %801 }
 0x3d4   :  { %v367_v40 = vadd.f32 1.0, %v802_v38 }
 0x3d6   :  { %803 = vrcp.f32 %v367_v40 }
 0x3e0   :  { %v804_v41 = vpop.eup %803 }
 0x3e1   :  { %371 = vrot.lane.b32.xlu1 %v804_v41, %s833_s8 }
 0x3f7   :  { %v272_v44 = vpop.xlane.xlu0 %271 }
 0x3f8   :  { %v273_v45 = vmul.f32 %v272_v44, %v264_v43 }
 0x3fa   :  { %805 = vrsqrt.f32 %v273_v45  ;;  %vm276_vm8 = vcmp.eq.f32.partialorder %v273_v45, inf  ;;  %v279_v55 = vand.u32 2147483648, %v273_v45  ;;  %vm278_vm9 = vcmp.eq.f32.partialorder %v273_v45, 0.0 }
 0x401   :  { %v352_v63 = vpop.permute.xlu0 %351 }
 0x402   :  { %v354_v0 = vsel %vm284_vm10, %v352_v63, 0.0 }
 0x404   :  { %v806_v51 = vpop.eup %805 }
 0x405   :  { %v275_v53 = vmul.f32 %v806_v51, %v273_v45  ;;  %227 = vadd.xlane.f32.xlu1 %v226_v52 }
 0x407   :  { %v256_v57 = vpop.xlane.xlu1 %255  ;;  %v277_v58 = vsel %vm276_vm8, %v273_v45, %v275_v53 }
 0x408   :  { %v280_v2 = vsel %vm278_vm9, %v279_v55, %v277_v58 }
 0x409   :  { %v281_v49 = vadd.f32 1e-12, %v280_v2 }
 0x40b   :  { %807 = vrcp.f32 %v281_v49  ;;  %v307_v60 = vpop.permute.xlu1 %306 }
 0x40c   :  { %v309_v61 = vsub.f32 %v302_v59, %v307_v60 }
 0x40e   :  { %v310_v62 = vsel %vm150_vm4, %v309_v61, 0.0 }
 0x40f   :  { %311 = vadd.xlane.f32.xlu1 %v310_v62 }
 0x413   :  { %355 = vadd.xlane.f32.xlu1 %v354_v0 }
 0x415   :  { %v808_v4 = vpop.eup %807 }
 0x416   :  { %v283_v1 = vmul.f32 %v808_v4, %v256_v57 }
 0x418   :  { %v285_v3 = vsel %vm284_vm10, %v283_v1, 0.0 }
 0x419   :  { %286 = vadd.xlane.f32.xlu0 %v285_v3 }
 0x453   :  { %v372_v42 = vpop.permute.xlu1 %371 }
 0x454   :  { %v374_v5 = vsel %vm284_vm10, %v372_v42, 0.0 }
 0x455   :  { %375 = vadd.xlane.f32.xlu1 %v374_v5 }
 0x492   :  { %v228_v6 = vpop.xlane.xlu1 %227 }
 0x493   :  { %v229_v7 = vrot.slane %v228_v6, 4 }
 0x495   :  { %v230_v8 = vadd.f32 %v229_v7, %v228_v6 }
 0x497   :  { %v231_v9 = vrot.slane %v230_v8, 2 }
 0x499   :  { %v232_v10 = vadd.f32 %v231_v9, %v230_v8 }
 0x49b   :  { %v233_v11 = vrot.slane %v232_v10, 1 }
 0x49c   :  { %v312_v12 = vpop.xlane.xlu1 %311 }
 0x49d   :  { %v234_v13 = vadd.f32 %v233_v11, %v232_v10  ;;  %v313_v14 = vrot.slane %v312_v12, 4 }
 0x49f   :  { %767 = vpush %v234_v13  ;;  %v314_v19 = vadd.f32 %v313_v14, %v312_v12 }
 0x4a0   :  { %v356_v16 = vpop.xlane.xlu1 %355 }
 0x4a1   :  { %v357_v17 = vrot.slane %v356_v16, 4  ;;  %v744_v18 = vpop.f32.mrb[4].mxu0  ;;  %v315_v24 = vrot.slane %v314_v19, 2 }
 0x4a2   :  { %v645_v20 = vadd.f32 %v744_v18, %v39_v15  ;;  %v639_v21 = vpop.f32.mrb[5].mxu0 }
 0x4a3   :  { %v358_v22 = vadd.f32 %v357_v17, %v356_v16  ;;  %v640_v23 = vadd.f32 %v639_v21, %v39_v15  ;;  %v316_v29 = vadd.f32 %v315_v24, %v314_v19 }
 0x4a4   :  { %650 = vst.msk [vmem:[%s990_s3 + $0x8] sm:$0xff] %vm648_vm11, %v645_v20 }
 0x4a5   :  { %649 = vst.msk [vmem:[%s990_s3] sm:$0xff] %vm648_vm11, %v640_v23  ;;  %v359_v26 = vrot.slane %v358_v22, 2  ;;  %v317_v33 = vrot.slane %v316_v29, 1 }
 0x4a6   :  { %v287_v25 = vpop.xlane.xlu0 %286 }
 0x4a7   :  { %v288_v27 = vrot.slane %v287_v25, 4  ;;  %v360_v31 = vadd.f32 %v359_v26, %v358_v22  ;;  %v318_v37 = vadd.f32 %v317_v33, %v316_v29 }
 0x4a9   :  { %v289_v28 = vadd.f32 %v288_v27, %v287_v25  ;;  %v361_v35 = vrot.slane %v360_v31, 1 }
 0x4ab   :  { %v290_v30 = vrot.slane %v289_v28, 2  ;;  %v362_v39 = vadd.f32 %v361_v35, %v360_v31 }
 0x4ad   :  { %v291_v32 = vadd.f32 %v290_v30, %v289_v28 }
 0x4af   :  { %v292_v34 = vrot.slane %v291_v32, 1 }
 0x4b1   :  { %v293_v36 = vadd.f32 %v292_v34, %v291_v32 }
 0x4b3   :  { %769 = vpush %v293_v36 }
 0x4b4   :  { %771 = vpush %v318_v37 }
 0x4b5   :  { %773 = vpush %v362_v39 }
 0x4d0   :  { %s768_s2 = spop %767 }
 0x4d1   :  { %s238_s17 = smul.f32 0.015625, %s768_s2 }
 0x4e2   :  { %v376_v38 = vpop.xlane.xlu1 %375 }
 0x4e3   :  { %v377_v40 = vrot.slane %v376_v38, 4 }
 0x4e4   :  { %s770_s3 = spop %769 }
 0x4e5   :  { %v378_v41 = vadd.f32 %v377_v40, %v376_v38  ;;  %s297_s14 = smul.f32 0.125, %s770_s3  ;;  %s772_s15 = spop %771 }
 0x4e6   :  { %s322_s16 = smul.f32 0.001953125, %s772_s15  ;;  %s774_s20 = spop %773 }
 0x4e7   :  { %v379_v43 = vrot.slane %v378_v41, 2 }
 0x4e8   :  { %s323_s18 = ssub.f32 %s297_s14, %s322_s16 }
 0x4e9   :  { %v380_v44 = vadd.f32 %v379_v43, %v378_v41 }
 0x4ea   :  { %s324_s19 = ssub.f32 %s323_s18, %s238_s17 }
 0x4eb   :  { %v381_v45 = vrot.slane %v380_v44, 1 }
 0x4ec   :  { %652 = sst [smem:[#allocation2]] %s324_s19 }
 0x4ed   :  { %v382_v46 = vadd.f32 %v381_v45, %v380_v44 }
 0x4ef   :  { %775 = vpush %v382_v46 }
 0x520   :  { %s776_s21 = spop %775 }
 0x521   :  { %s384_s22 = sadd.f32 %s776_s21, %s774_s20 }
 0x523   :  { %s387_s26 = smul.f32 0.0625, %s384_s22 }
 0x525   :  { %s677_s27 = sadd.f32 -1.0, %s387_s26 }
 0x527   :  { %654 = sst [smem:[#allocation2 + $0x1]] %s677_s27 }
 0x528   :  { %820 = shalt.err (!%p817_p4)
}
 0x529   :  { %s834_s28 = smov [#allocation2]  }
 0x52a   :  { %666 = dma.smem_to_vmem %s834_s28, 16, %s664_s25, [#allocation3]  }
 0x52b   :  { %821 = dma.done.wait [#allocation3], 16  }
 0x52c   :  { %822 = vsyncadd [#allocation3], 4294967280 }
 0x52d   :  { %672 = sfence }
 0x52e   :  { %673 = vsyncpa [#allocation3], 1 }

</bundles_post_ra>
